<compile_context>
chip_gen: v7x
topology: tpu7x:2x2x1
jax: 0.10.0
libtpu: 0.0.40
codegen_flags: <defaults>
</compile_context>

<pallas_src>
import math
from functools import partial

import jax
import jax.numpy as jnp
from jax import lax
from jax.experimental import pallas as pl
from jax.experimental.pallas import tpu as pltpu

# ----------------------------- small Gemma-like config -----------------------------
BATCH = 2
SEQ = 8
HIDDEN = 64
NUM_HEADS = 4
NUM_KV_HEADS = 2
HEAD_DIM = 128                      # lane-aligned head dim (real Gemma uses 256)
GROUPS = NUM_HEADS // NUM_KV_HEADS  # num_key_value_groups
ROPE_THETA = 10000.0
SCALING = 1.0 / math.sqrt(HEAD_DIM)
NEG_MASK = -1e30                    # large finite additive mask (NaN-safe)


# ----------------------------- fused attention kernel -----------------------------
def gemma_attn_kernel(x_ref, wq_ref, wk_ref, wv_ref, wo_ref, cos_ref, sin_ref,
                      o_ref, ctx_sc, *, batch, seq, num_heads, num_kv_heads,
                      head_dim):
    B, S, D = batch, seq, head_dim
    G = num_heads // num_kv_heads

    x = x_ref[...]                                                    # (B*S, H) bf16

    # Projections: bf16 MXU inputs, f32 accumulation, M = B*S rows in one push.
    # (scaling is already folded into wq on the host.)
    q = jnp.dot(x, wq_ref[...], preferred_element_type=jnp.float32)  # (B*S, nH*D)
    k = jnp.dot(x, wk_ref[...], preferred_element_type=jnp.float32)  # (B*S, nKV*D)
    v = jnp.dot(x, wv_ref[...], preferred_element_type=jnp.float32)  # (B*S, nKV*D)

    cos = cos_ref[...]                                                # (B*S, D) f32
    sin = sin_ref[...]                                                # (B*S, D) f32

    def rotate_half(t):                                               # (B*S, D) f32
        return jnp.concatenate([-t[:, D // 2:], t[:, :D // 2]], axis=-1)

    def rope(t):                                                      # (B*S, D) f32
        return t * cos + rotate_half(t) * sin

    # Rotate all head slices once (each kv head is shared by G query heads).
    q_rot = [rope(q[:, h * D:(h + 1) * D]).astype(jnp.bfloat16)
             for h in range(num_heads)]
    k_rot = [rope(k[:, g * D:(g + 1) * D]).astype(jnp.bfloat16)
             for g in range(num_kv_heads)]
    v_h = [v[:, g * D:(g + 1) * D].astype(jnp.bfloat16)
           for g in range(num_kv_heads)]

    # Additive causal mask for a (G*S, S) score block: rows are the G query heads
    # of a KV group stacked along M, row r corresponds to token (r % S).
    row = lax.broadcasted_iota(jnp.int32, (G * S, S), 0) % S
    col = lax.broadcasted_iota(jnp.int32, (G * S, S), 1)
    mask = jnp.where(col <= row, 0.0, NEG_MASK).astype(jnp.float32)

    for b in range(B):
        rs = slice(b * S, (b + 1) * S)
        for g in range(num_kv_heads):
            kh = k_rot[g][rs]                                         # (S, D) bf16
            vh = v_h[g][rs]                                           # (S, D) bf16
            # Stack this KV head's G query heads along M (GQA batching).
            qg = jnp.concatenate([q_rot[g * G + j][rs] for j in range(G)],
                                 axis=0)                              # (G*S, D) bf16

            # scores = q @ k^T  (scaling already in wq); f32 accumulation.
            scores = lax.dot_general(qg, kh, (((1,), (1,)), ((), ())),
                                     preferred_element_type=jnp.float32)
            scores = scores + mask                                    # (G*S, S) f32

            # Numerically stable softmax in f32 (exact normalization).
            m = jnp.max(scores, axis=-1, keepdims=True)
            e = jnp.exp(scores - m)
            p = e / jnp.sum(e, axis=-1, keepdims=True)

            ctx = jnp.dot(p.astype(jnp.bfloat16), vh,
                          preferred_element_type=jnp.float32)         # (G*S, D) f32
            ctx_bf = ctx.astype(jnp.bfloat16)

            # Static (8,128)-aligned writes into the ctx scratch: row block = batch
            # tokens, column block = head.  Avoids a 4-way lane concatenate.
            for j in range(G):
                h = g * G + j
                ctx_sc[b * S:(b + 1) * S, h * D:(h + 1) * D] = \
                    ctx_bf[j * S:(j + 1) * S, :]

    # Single deep-contraction o_proj over all batches/heads:
    # (B*S, nH*D) @ (nH*D, H), f32 accumulation.
    o_ref[...] = jnp.dot(ctx_sc[...], wo_ref[...],
                         preferred_element_type=jnp.float32)


# ----------------------------- host-side glue -----------------------------
def gemma_attention_forward(x, wq, wk, wv, wo):
    B, S, H = x.shape
    D, nH, nKV = HEAD_DIM, NUM_HEADS, NUM_KV_HEADS

    # GemmaRotaryEmbedding tables (position_ids = arange(S) per batch), tiled to
    # (B*S, D) so kernel row b*S + s picks up position s directly.
    inv_freq = 1.0 / (ROPE_THETA ** (jnp.arange(0, D, 2, dtype=jnp.float32) / D))
    pos = jnp.arange(S, dtype=jnp.float32)
    freqs = pos[:, None] * inv_freq[None, :]                          # (S, D/2)
    emb = jnp.concatenate([freqs, freqs], axis=-1)                    # (S, D)
    cos = jnp.tile(jnp.cos(emb).astype(jnp.float32), (B, 1))          # (B*S, D)
    sin = jnp.tile(jnp.sin(emb).astype(jnp.float32), (B, 1))          # (B*S, D)

    # bf16 MXU operands; fold 1/sqrt(head_dim) into wq (RoPE is linear).
    x_bf = x.reshape(B * S, H).astype(jnp.bfloat16)
    wq_bf = (wq * SCALING).astype(jnp.bfloat16)
    wk_bf = wk.astype(jnp.bfloat16)
    wv_bf = wv.astype(jnp.bfloat16)
    wo_bf = wo.astype(jnp.bfloat16)

    kern = partial(gemma_attn_kernel, batch=B, seq=S, num_heads=nH,
                   num_kv_heads=nKV, head_dim=D)

    out = pl.pallas_call(
        kern,
        grid=(1,),
        in_specs=[
            pl.BlockSpec((B * S, H), lambda i: (0, 0)),               # x (batch-folded)
            pl.BlockSpec((H, nH * D), lambda i: (0, 0)),              # wq (pre-scaled)
            pl.BlockSpec((H, nKV * D), lambda i: (0, 0)),             # wk
            pl.BlockSpec((H, nKV * D), lambda i: (0, 0)),             # wv
            pl.BlockSpec((nH * D, H), lambda i: (0, 0)),              # wo
            pl.BlockSpec((B * S, D), lambda i: (0, 0)),               # cos
            pl.BlockSpec((B * S, D), lambda i: (0, 0)),               # sin
        ],
        out_specs=pl.BlockSpec((B * S, H), lambda i: (0, 0)),
        out_shape=jax.ShapeDtypeStruct((B * S, H), jnp.float32),
        scratch_shapes=[pltpu.VMEM((B * S, nH * D), jnp.bfloat16)],   # ctx slab
        compiler_params=pltpu.CompilerParams(
            dimension_semantics=("arbitrary",)),
    )(x_bf, wq_bf, wk_bf, wv_bf, wo_bf, cos, sin)

    return out.reshape(B, S, H)


# ----------------------------- pure-JAX reference -----------------------------
def reference_forward(x, wq, wk, wv, wo):
    B, S, H = x.shape
    D, nH, nKV, G = HEAD_DIM, NUM_HEADS, NUM_KV_HEADS, GROUPS
    xf = x.reshape(B * S, H)
    q = (xf @ wq).reshape(B, S, nH, D).transpose(0, 2, 1, 3)
    k = (xf @ wk).reshape(B, S, nKV, D).transpose(0, 2, 1, 3)
    v = (xf @ wv).reshape(B, S, nKV, D).transpose(0, 2, 1, 3)

    inv_freq = 1.0 / (ROPE_THETA ** (jnp.arange(0, D, 2, dtype=jnp.float32) / D))
    pos = jnp.arange(S, dtype=jnp.float32)
    freqs = pos[:, None] * inv_freq[None, :]
    emb = jnp.concatenate([freqs, freqs], axis=-1)
    cos = jnp.cos(emb)[None, None]
    sin = jnp.sin(emb)[None, None]

    def rot_half(t):
        return jnp.concatenate([-t[..., D // 2:], t[..., :D // 2]], axis=-1)

    q = q * cos + rot_half(q) * sin
    k = k * cos + rot_half(k) * sin
    k = jnp.repeat(k, G, axis=1)
    v = jnp.repeat(v, G, axis=1)

    scores = jnp.einsum('bhqd,bhkd->bhqk', q, k) * SCALING
    idx = jnp.arange(S)
    mask = jnp.where(idx[None, :] <= idx[:, None], 0.0, NEG_MASK)
    scores = scores + mask[None, None]
    p = jax.nn.softmax(scores, axis=-1)
    ctx = jnp.einsum('bhqk,bhkd->bhqd', p, v)
    ctx = ctx.transpose(0, 2, 1, 3).reshape(B * S, nH * D)
    return (ctx @ wo).reshape(B, S, H)


# ----------------------------- main -----------------------------
if __name__ == "__main__":
    key = jax.random.PRNGKey(0)
    kx, kq, kk, kv, ko = jax.random.split(key, 5)

    x = jax.random.normal(kx, (BATCH, SEQ, HIDDEN), dtype=jnp.float32)

    def linear_w(k, fan_in, fan_out):   # nn.Linear default init, stored as (in, out)
        bound = 1.0 / math.sqrt(fan_in)
        return jax.random.uniform(k, (fan_in, fan_out), jnp.float32, -bound, bound)

    wq = linear_w(kq, HIDDEN, NUM_HEADS * HEAD_DIM)
    wk = linear_w(kk, HIDDEN, NUM_KV_HEADS * HEAD_DIM)
    wv = linear_w(kv, HIDDEN, NUM_KV_HEADS * HEAD_DIM)
    wo = linear_w(ko, NUM_HEADS * HEAD_DIM, HIDDEN)

    out = gemma_attention_forward(x, wq, wk, wv, wo)
    out = jax.block_until_ready(out)

    with jax.default_matmul_precision('highest'):
        ref = jax.block_until_ready(reference_forward(x, wq, wk, wv, wo))

    if not jnp.allclose(out, ref, atol=2e-2, rtol=2e-2):
        raise AssertionError(
            f"mismatch: max abs err = {float(jnp.max(jnp.abs(out - ref)))}")

    print("KERNEL_OK")
</pallas_src>

<mosaic_0001>
module attributes {stable_mosaic.version = 11 : i64} {
  func.func @gemma_attn_kernel(%arg0: i32, %arg1: memref<16x64xbf16, #tpu.memory_space<vmem>>, %arg2: memref<64x512xbf16, #tpu.memory_space<vmem>>, %arg3: memref<64x256xbf16, #tpu.memory_space<vmem>>, %arg4: memref<64x256xbf16, #tpu.memory_space<vmem>>, %arg5: memref<512x64xbf16, #tpu.memory_space<vmem>>, %arg6: memref<16x128xf32, #tpu.memory_space<vmem>>, %arg7: memref<16x128xf32, #tpu.memory_space<vmem>>, %arg8: memref<16x64xf32, #tpu.memory_space<vmem>>, %arg9: memref<16x512xbf16, #tpu.memory_space<vmem>>) attributes {dimension_semantics = [#tpu.dimension_semantics<arbitrary>], iteration_bounds = array<i64: 1>, scalar_prefetch = 0 : i64, scratch_operands = 1 : i64, tpu.core_type = #tpu.core_type<tc>, window_params = [{pipeline_mode = #tpu.pipeline_mode<synchronous>, transform_indices = @transform_0, window_bounds = array<i64: 16, 64>}, {pipeline_mode = #tpu.pipeline_mode<synchronous>, transform_indices = @transform_1, window_bounds = array<i64: 64, 512>}, {pipeline_mode = #tpu.pipeline_mode<synchronous>, transform_indices = @transform_2, window_bounds = array<i64: 64, 256>}, {pipeline_mode = #tpu.pipeline_mode<synchronous>, transform_indices = @transform_3, window_bounds = array<i64: 64, 256>}, {pipeline_mode = #tpu.pipeline_mode<synchronous>, transform_indices = @transform_4, window_bounds = array<i64: 512, 64>}, {pipeline_mode = #tpu.pipeline_mode<synchronous>, transform_indices = @transform_5, window_bounds = array<i64: 16, 128>}, {pipeline_mode = #tpu.pipeline_mode<synchronous>, transform_indices = @transform_6, window_bounds = array<i64: 16, 128>}, {pipeline_mode = #tpu.pipeline_mode<synchronous>, transform_indices = @transform_7, window_bounds = array<i64: 16, 64>}]} {
    %c0 = arith.constant 0 : index
    %c0_0 = arith.constant 0 : index
    %0 = vector.load %arg1[%c0, %c0_0] : memref<16x64xbf16, #tpu.memory_space<vmem>>, vector<16x64xbf16>
    %c0_1 = arith.constant 0 : index
    %c0_2 = arith.constant 0 : index
    %1 = vector.load %arg2[%c0_1, %c0_2] : memref<64x512xbf16, #tpu.memory_space<vmem>>, vector<64x512xbf16>
    %cst = arith.constant dense<0.000000e+00> : vector<16x512xf32>
    %2 = tpu.matmul %0, %1, %cst {dimension_numbers = #tpu.dot_dimension_numbers<[1], [0], [0], [1], [0, 0, 1, 1], [], []>} : vector<16x64xbf16>, vector<64x512xbf16>, vector<16x512xf32> -> vector<16x512xf32>
    %c0_3 = arith.constant 0 : index
    %c0_4 = arith.constant 0 : index
    %3 = vector.load %arg3[%c0_3, %c0_4] : memref<64x256xbf16, #tpu.memory_space<vmem>>, vector<64x256xbf16>
    %cst_5 = arith.constant dense<0.000000e+00> : vector<16x256xf32>
    %4 = tpu.matmul %0, %3, %cst_5 {dimension_numbers = #tpu.dot_dimension_numbers<[1], [0], [0], [1], [0, 0, 1, 1], [], []>} : vector<16x64xbf16>, vector<64x256xbf16>, vector<16x256xf32> -> vector<16x256xf32>
    %c0_6 = arith.constant 0 : index
    %c0_7 = arith.constant 0 : index
    %5 = vector.load %arg4[%c0_6, %c0_7] : memref<64x256xbf16, #tpu.memory_space<vmem>>, vector<64x256xbf16>
    %cst_8 = arith.constant dense<0.000000e+00> : vector<16x256xf32>
    %6 = tpu.matmul %0, %5, %cst_8 {dimension_numbers = #tpu.dot_dimension_numbers<[1], [0], [0], [1], [0, 0, 1, 1], [], []>} : vector<16x64xbf16>, vector<64x256xbf16>, vector<16x256xf32> -> vector<16x256xf32>
    %c0_9 = arith.constant 0 : index
    %c0_10 = arith.constant 0 : index
    %7 = vector.load %arg6[%c0_9, %c0_10] : memref<16x128xf32, #tpu.memory_space<vmem>>, vector<16x128xf32>
    %c0_11 = arith.constant 0 : index
    %c0_12 = arith.constant 0 : index
    %8 = vector.load %arg7[%c0_11, %c0_12] : memref<16x128xf32, #tpu.memory_space<vmem>>, vector<16x128xf32>
    %9 = vector.extract_strided_slice %2 {offsets = [0, 0], sizes = [16, 128], strides = [1, 1]} : vector<16x512xf32> to vector<16x128xf32>
    %10 = arith.mulf %9, %7 : vector<16x128xf32>
    %11 = vector.extract_strided_slice %9 {offsets = [0, 64], sizes = [16, 64], strides = [1, 1]} : vector<16x128xf32> to vector<16x64xf32>
    %cst_13 = arith.constant 0.000000e+00 : f32
    %12 = vector.broadcast %cst_13 : f32 to vector<16x64xf32>
    %13 = arith.subf %12, %11 : vector<16x64xf32>
    %14 = vector.extract_strided_slice %9 {offsets = [0, 0], sizes = [16, 64], strides = [1, 1]} : vector<16x128xf32> to vector<16x64xf32>
    %15 = tpu.concatenate %13, %14 in 1 : vector<16x64xf32>, vector<16x64xf32> -> vector<16x128xf32>
    %16 = arith.mulf %15, %8 : vector<16x128xf32>
    %17 = arith.addf %10, %16 : vector<16x128xf32>
    %18 = arith.truncf %17 : vector<16x128xf32> to vector<16x128xbf16>
    %19 = vector.extract_strided_slice %2 {offsets = [0, 128], sizes = [16, 128], strides = [1, 1]} : vector<16x512xf32> to vector<16x128xf32>
    %20 = arith.mulf %19, %7 : vector<16x128xf32>
    %21 = vector.extract_strided_slice %19 {offsets = [0, 64], sizes = [16, 64], strides = [1, 1]} : vector<16x128xf32> to vector<16x64xf32>
    %cst_14 = arith.constant 0.000000e+00 : f32
    %22 = vector.broadcast %cst_14 : f32 to vector<16x64xf32>
    %23 = arith.subf %22, %21 : vector<16x64xf32>
    %24 = vector.extract_strided_slice %19 {offsets = [0, 0], sizes = [16, 64], strides = [1, 1]} : vector<16x128xf32> to vector<16x64xf32>
    %25 = tpu.concatenate %23, %24 in 1 : vector<16x64xf32>, vector<16x64xf32> -> vector<16x128xf32>
    %26 = arith.mulf %25, %8 : vector<16x128xf32>
    %27 = arith.addf %20, %26 : vector<16x128xf32>
    %28 = arith.truncf %27 : vector<16x128xf32> to vector<16x128xbf16>
    %29 = vector.extract_strided_slice %2 {offsets = [0, 256], sizes = [16, 128], strides = [1, 1]} : vector<16x512xf32> to vector<16x128xf32>
    %30 = arith.mulf %29, %7 : vector<16x128xf32>
    %31 = vector.extract_strided_slice %29 {offsets = [0, 64], sizes = [16, 64], strides = [1, 1]} : vector<16x128xf32> to vector<16x64xf32>
    %cst_15 = arith.constant 0.000000e+00 : f32
    %32 = vector.broadcast %cst_15 : f32 to vector<16x64xf32>
    %33 = arith.subf %32, %31 : vector<16x64xf32>
    %34 = vector.extract_strided_slice %29 {offsets = [0, 0], sizes = [16, 64], strides = [1, 1]} : vector<16x128xf32> to vector<16x64xf32>
    %35 = tpu.concatenate %33, %34 in 1 : vector<16x64xf32>, vector<16x64xf32> -> vector<16x128xf32>
    %36 = arith.mulf %35, %8 : vector<16x128xf32>
    %37 = arith.addf %30, %36 : vector<16x128xf32>
    %38 = arith.truncf %37 : vector<16x128xf32> to vector<16x128xbf16>
    %39 = vector.extract_strided_slice %2 {offsets = [0, 384], sizes = [16, 128], strides = [1, 1]} : vector<16x512xf32> to vector<16x128xf32>
    %40 = arith.mulf %39, %7 : vector<16x128xf32>
    %41 = vector.extract_strided_slice %39 {offsets = [0, 64], sizes = [16, 64], strides = [1, 1]} : vector<16x128xf32> to vector<16x64xf32>
    %cst_16 = arith.constant 0.000000e+00 : f32
    %42 = vector.broadcast %cst_16 : f32 to vector<16x64xf32>
    %43 = arith.subf %42, %41 : vector<16x64xf32>
    %44 = vector.extract_strided_slice %39 {offsets = [0, 0], sizes = [16, 64], strides = [1, 1]} : vector<16x128xf32> to vector<16x64xf32>
    %45 = tpu.concatenate %43, %44 in 1 : vector<16x64xf32>, vector<16x64xf32> -> vector<16x128xf32>
    %46 = arith.mulf %45, %8 : vector<16x128xf32>
    %47 = arith.addf %40, %46 : vector<16x128xf32>
    %48 = arith.truncf %47 : vector<16x128xf32> to vector<16x128xbf16>
    %49 = vector.extract_strided_slice %4 {offsets = [0, 0], sizes = [16, 128], strides = [1, 1]} : vector<16x256xf32> to vector<16x128xf32>
    %50 = arith.mulf %49, %7 : vector<16x128xf32>
    %51 = vector.extract_strided_slice %49 {offsets = [0, 64], sizes = [16, 64], strides = [1, 1]} : vector<16x128xf32> to vector<16x64xf32>
    %cst_17 = arith.constant 0.000000e+00 : f32
    %52 = vector.broadcast %cst_17 : f32 to vector<16x64xf32>
    %53 = arith.subf %52, %51 : vector<16x64xf32>
    %54 = vector.extract_strided_slice %49 {offsets = [0, 0], sizes = [16, 64], strides = [1, 1]} : vector<16x128xf32> to vector<16x64xf32>
    %55 = tpu.concatenate %53, %54 in 1 : vector<16x64xf32>, vector<16x64xf32> -> vector<16x128xf32>
    %56 = arith.mulf %55, %8 : vector<16x128xf32>
    %57 = arith.addf %50, %56 : vector<16x128xf32>
    %58 = arith.truncf %57 : vector<16x128xf32> to vector<16x128xbf16>
    %59 = vector.extract_strided_slice %4 {offsets = [0, 128], sizes = [16, 128], strides = [1, 1]} : vector<16x256xf32> to vector<16x128xf32>
    %60 = arith.mulf %59, %7 : vector<16x128xf32>
    %61 = vector.extract_strided_slice %59 {offsets = [0, 64], sizes = [16, 64], strides = [1, 1]} : vector<16x128xf32> to vector<16x64xf32>
    %cst_18 = arith.constant 0.000000e+00 : f32
    %62 = vector.broadcast %cst_18 : f32 to vector<16x64xf32>
    %63 = arith.subf %62, %61 : vector<16x64xf32>
    %64 = vector.extract_strided_slice %59 {offsets = [0, 0], sizes = [16, 64], strides = [1, 1]} : vector<16x128xf32> to vector<16x64xf32>
    %65 = tpu.concatenate %63, %64 in 1 : vector<16x64xf32>, vector<16x64xf32> -> vector<16x128xf32>
    %66 = arith.mulf %65, %8 : vector<16x128xf32>
    %67 = arith.addf %60, %66 : vector<16x128xf32>
    %68 = arith.truncf %67 : vector<16x128xf32> to vector<16x128xbf16>
    %69 = vector.extract_strided_slice %6 {offsets = [0, 0], sizes = [16, 128], strides = [1, 1]} : vector<16x256xf32> to vector<16x128xf32>
    %70 = arith.truncf %69 : vector<16x128xf32> to vector<16x128xbf16>
    %71 = vector.extract_strided_slice %6 {offsets = [0, 128], sizes = [16, 128], strides = [1, 1]} : vector<16x256xf32> to vector<16x128xf32>
    %72 = arith.truncf %71 : vector<16x128xf32> to vector<16x128xbf16>
    %73 = tpu.iota {dimensions = array<i32: 0>} : vector<16x8xi32>
    %c8_i32 = arith.constant 8 : i32
    %c0_i32 = arith.constant 0 : i32
    %74 = arith.cmpi eq, %c8_i32, %c0_i32 : i32
    %c1_i32 = arith.constant 1 : i32
    %75 = arith.select %74, %c1_i32, %c8_i32 : i32
    %76 = vector.broadcast %75 : i32 to vector<16x8xi32>
    %77 = arith.remsi %73, %76 : vector<16x8xi32>
    %c0_i32_19 = arith.constant 0 : i32
    %78 = vector.broadcast %c0_i32_19 : i32 to vector<16x8xi32>
    %79 = arith.cmpi ne, %77, %78 : vector<16x8xi32>
    %c0_i32_20 = arith.constant 0 : i32
    %80 = vector.broadcast %c0_i32_20 : i32 to vector<16x8xi32>
    %81 = arith.cmpi slt, %77, %80 : vector<16x8xi32>
    %c0_i32_21 = arith.constant 0 : i32
    %82 = arith.cmpi slt, %75, %c0_i32_21 : i32
    %83 = vector.broadcast %82 : i1 to vector<16x8xi1>
    %84 = vector.broadcast %83 : vector<16x8xi1> to vector<16x8xi1>
    %85 = arith.xori %81, %84 : vector<16x8xi1>
    %86 = arith.andi %85, %79 : vector<16x8xi1>
    %87 = vector.broadcast %75 : i32 to vector<16x8xi32>
    %88 = arith.addi %77, %87 : vector<16x8xi32>
    %89 = arith.select %86, %88, %77 : vector<16x8xi1>, vector<16x8xi32>
    %90 = tpu.iota {dimensions = array<i32: 1>} : vector<16x8xi32>
    %91 = arith.cmpi sle, %90, %89 : vector<16x8xi32>
    %cst_22 = arith.constant 0.000000e+00 : f32
    %cst_23 = arith.constant -1.000000e+30 : f32
    %92 = vector.broadcast %cst_22 : f32 to vector<16x8xf32>
    %93 = vector.broadcast %cst_23 : f32 to vector<16x8xf32>
    %94 = arith.select %91, %92, %93 : vector<16x8xi1>, vector<16x8xf32>
    %95 = vector.extract_strided_slice %58 {offsets = [0, 0], sizes = [8, 128], strides = [1, 1]} : vector<16x128xbf16> to vector<8x128xbf16>
    %96 = vector.extract_strided_slice %70 {offsets = [0, 0], sizes = [8, 128], strides = [1, 1]} : vector<16x128xbf16> to vector<8x128xbf16>
    %97 = vector.extract_strided_slice %18 {offsets = [0, 0], sizes = [8, 128], strides = [1, 1]} : vector<16x128xbf16> to vector<8x128xbf16>
    %98 = vector.extract_strided_slice %28 {offsets = [0, 0], sizes = [8, 128], strides = [1, 1]} : vector<16x128xbf16> to vector<8x128xbf16>
    %99 = tpu.concatenate %97, %98 in 0 : vector<8x128xbf16>, vector<8x128xbf16> -> vector<16x128xbf16>
    %cst_24 = arith.constant dense<0.000000e+00> : vector<16x8xf32>
    %100 = tpu.matmul %99, %95, %cst_24 {dimension_numbers = #tpu.dot_dimension_numbers<[1], [1], [0], [0], [0, 0, 1, 0], [], []>} : vector<16x128xbf16>, vector<8x128xbf16>, vector<16x8xf32> -> vector<16x8xf32>
    %101 = arith.addf %100, %94 : vector<16x8xf32>
    %cst_25 = arith.constant dense<0xFF800000> : vector<16xf32>
    %102 = vector.multi_reduction <maximumf>, %101, %cst_25 [1] : vector<16x8xf32> to vector<16xf32>
    %103 = vector.shape_cast %102 : vector<16xf32> to vector<16x1xf32>
    %104 = vector.broadcast %103 : vector<16x1xf32> to vector<16x8xf32>
    %105 = arith.subf %101, %104 : vector<16x8xf32>
    %106 = math.exp %105 : vector<16x8xf32>
    %cst_26 = arith.constant dense<0.000000e+00> : vector<16xf32>
    %107 = vector.multi_reduction <add>, %106, %cst_26 [1] : vector<16x8xf32> to vector<16xf32>
    %108 = vector.shape_cast %107 : vector<16xf32> to vector<16x1xf32>
    %109 = vector.broadcast %108 : vector<16x1xf32> to vector<16x8xf32>
    %110 = arith.divf %106, %109 : vector<16x8xf32>
    %111 = arith.truncf %110 : vector<16x8xf32> to vector<16x8xbf16>
    %cst_27 = arith.constant dense<0.000000e+00> : vector<16x128xf32>
    %112 = tpu.matmul %111, %96, %cst_27 {dimension_numbers = #tpu.dot_dimension_numbers<[1], [0], [0], [1], [0, 0, 1, 1], [], []>} : vector<16x8xbf16>, vector<8x128xbf16>, vector<16x128xf32> -> vector<16x128xf32>
    %113 = arith.truncf %112 : vector<16x128xf32> to vector<16x128xbf16>
    %114 = vector.extract_strided_slice %113 {offsets = [0, 0], sizes = [8, 128], strides = [1, 1]} : vector<16x128xbf16> to vector<8x128xbf16>
    %c0_28 = arith.constant 0 : index
    %c0_29 = arith.constant 0 : index
    %115 = vector.load %arg9[%c0_28, %c0_29] : memref<16x512xbf16, #tpu.memory_space<vmem>>, vector<8x128xbf16>
    tpu.vector_store %arg9[%c0_28, %c0_29], %114 {strides = array<i32>} : memref<16x512xbf16, #tpu.memory_space<vmem>>, vector<8x128xbf16>,
    %116 = vector.extract_strided_slice %113 {offsets = [8, 0], sizes = [8, 128], strides = [1, 1]} : vector<16x128xbf16> to vector<8x128xbf16>
    %c0_30 = arith.constant 0 : index
    %c128 = arith.constant 128 : index
    %117 = vector.load %arg9[%c0_30, %c128] : memref<16x512xbf16, #tpu.memory_space<vmem>>, vector<8x128xbf16>
    tpu.vector_store %arg9[%c0_30, %c128], %116 {strides = array<i32>} : memref<16x512xbf16, #tpu.memory_space<vmem>>, vector<8x128xbf16>,
    %118 = vector.extract_strided_slice %68 {offsets = [0, 0], sizes = [8, 128], strides = [1, 1]} : vector<16x128xbf16> to vector<8x128xbf16>
    %119 = vector.extract_strided_slice %72 {offsets = [0, 0], sizes = [8, 128], strides = [1, 1]} : vector<16x128xbf16> to vector<8x128xbf16>
    %120 = vector.extract_strided_slice %38 {offsets = [0, 0], sizes = [8, 128], strides = [1, 1]} : vector<16x128xbf16> to vector<8x128xbf16>
    %121 = vector.extract_strided_slice %48 {offsets = [0, 0], sizes = [8, 128], strides = [1, 1]} : vector<16x128xbf16> to vector<8x128xbf16>
    %122 = tpu.concatenate %120, %121 in 0 : vector<8x128xbf16>, vector<8x128xbf16> -> vector<16x128xbf16>
    %cst_31 = arith.constant dense<0.000000e+00> : vector<16x8xf32>
    %123 = tpu.matmul %122, %118, %cst_31 {dimension_numbers = #tpu.dot_dimension_numbers<[1], [1], [0], [0], [0, 0, 1, 0], [], []>} : vector<16x128xbf16>, vector<8x128xbf16>, vector<16x8xf32> -> vector<16x8xf32>
    %124 = arith.addf %123, %94 : vector<16x8xf32>
    %cst_32 = arith.constant dense<0xFF800000> : vector<16xf32>
    %125 = vector.multi_reduction <maximumf>, %124, %cst_32 [1] : vector<16x8xf32> to vector<16xf32>
    %126 = vector.shape_cast %125 : vector<16xf32> to vector<16x1xf32>
    %127 = vector.broadcast %126 : vector<16x1xf32> to vector<16x8xf32>
    %128 = arith.subf %124, %127 : vector<16x8xf32>
    %129 = math.exp %128 : vector<16x8xf32>
    %cst_33 = arith.constant dense<0.000000e+00> : vector<16xf32>
    %130 = vector.multi_reduction <add>, %129, %cst_33 [1] : vector<16x8xf32> to vector<16xf32>
    %131 = vector.shape_cast %130 : vector<16xf32> to vector<16x1xf32>
    %132 = vector.broadcast %131 : vector<16x1xf32> to vector<16x8xf32>
    %133 = arith.divf %129, %132 : vector<16x8xf32>
    %134 = arith.truncf %133 : vector<16x8xf32> to vector<16x8xbf16>
    %cst_34 = arith.constant dense<0.000000e+00> : vector<16x128xf32>
    %135 = tpu.matmul %134, %119, %cst_34 {dimension_numbers = #tpu.dot_dimension_numbers<[1], [0], [0], [1], [0, 0, 1, 1], [], []>} : vector<16x8xbf16>, vector<8x128xbf16>, vector<16x128xf32> -> vector<16x128xf32>
    %136 = arith.truncf %135 : vector<16x128xf32> to vector<16x128xbf16>
    %137 = vector.extract_strided_slice %136 {offsets = [0, 0], sizes = [8, 128], strides = [1, 1]} : vector<16x128xbf16> to vector<8x128xbf16>
    %c0_35 = arith.constant 0 : index
    %c256 = arith.constant 256 : index
    %138 = vector.load %arg9[%c0_35, %c256] : memref<16x512xbf16, #tpu.memory_space<vmem>>, vector<8x128xbf16>
    tpu.vector_store %arg9[%c0_35, %c256], %137 {strides = array<i32>} : memref<16x512xbf16, #tpu.memory_space<vmem>>, vector<8x128xbf16>,
    %139 = vector.extract_strided_slice %136 {offsets = [8, 0], sizes = [8, 128], strides = [1, 1]} : vector<16x128xbf16> to vector<8x128xbf16>
    %c0_36 = arith.constant 0 : index
    %c384 = arith.constant 384 : index
    %140 = vector.load %arg9[%c0_36, %c384] : memref<16x512xbf16, #tpu.memory_space<vmem>>, vector<8x128xbf16>
    tpu.vector_store %arg9[%c0_36, %c384], %139 {strides = array<i32>} : memref<16x512xbf16, #tpu.memory_space<vmem>>, vector<8x128xbf16>,
    %141 = vector.extract_strided_slice %58 {offsets = [8, 0], sizes = [8, 128], strides = [1, 1]} : vector<16x128xbf16> to vector<8x128xbf16>
    %142 = vector.extract_strided_slice %70 {offsets = [8, 0], sizes = [8, 128], strides = [1, 1]} : vector<16x128xbf16> to vector<8x128xbf16>
    %143 = vector.extract_strided_slice %18 {offsets = [8, 0], sizes = [8, 128], strides = [1, 1]} : vector<16x128xbf16> to vector<8x128xbf16>
    %144 = vector.extract_strided_slice %28 {offsets = [8, 0], sizes = [8, 128], strides = [1, 1]} : vector<16x128xbf16> to vector<8x128xbf16>
    %145 = tpu.concatenate %143, %144 in 0 : vector<8x128xbf16>, vector<8x128xbf16> -> vector<16x128xbf16>
    %cst_37 = arith.constant dense<0.000000e+00> : vector<16x8xf32>
    %146 = tpu.matmul %145, %141, %cst_37 {dimension_numbers = #tpu.dot_dimension_numbers<[1], [1], [0], [0], [0, 0, 1, 0], [], []>} : vector<16x128xbf16>, vector<8x128xbf16>, vector<16x8xf32> -> vector<16x8xf32>
    %147 = arith.addf %146, %94 : vector<16x8xf32>
    %cst_38 = arith.constant dense<0xFF800000> : vector<16xf32>
    %148 = vector.multi_reduction <maximumf>, %147, %cst_38 [1] : vector<16x8xf32> to vector<16xf32>
    %149 = vector.shape_cast %148 : vector<16xf32> to vector<16x1xf32>
    %150 = vector.broadcast %149 : vector<16x1xf32> to vector<16x8xf32>
    %151 = arith.subf %147, %150 : vector<16x8xf32>
    %152 = math.exp %151 : vector<16x8xf32>
    %cst_39 = arith.constant dense<0.000000e+00> : vector<16xf32>
    %153 = vector.multi_reduction <add>, %152, %cst_39 [1] : vector<16x8xf32> to vector<16xf32>
    %154 = vector.shape_cast %153 : vector<16xf32> to vector<16x1xf32>
    %155 = vector.broadcast %154 : vector<16x1xf32> to vector<16x8xf32>
    %156 = arith.divf %152, %155 : vector<16x8xf32>
    %157 = arith.truncf %156 : vector<16x8xf32> to vector<16x8xbf16>
    %cst_40 = arith.constant dense<0.000000e+00> : vector<16x128xf32>
    %158 = tpu.matmul %157, %142, %cst_40 {dimension_numbers = #tpu.dot_dimension_numbers<[1], [0], [0], [1], [0, 0, 1, 1], [], []>} : vector<16x8xbf16>, vector<8x128xbf16>, vector<16x128xf32> -> vector<16x128xf32>
    %159 = arith.truncf %158 : vector<16x128xf32> to vector<16x128xbf16>
    %160 = vector.extract_strided_slice %159 {offsets = [0, 0], sizes = [8, 128], strides = [1, 1]} : vector<16x128xbf16> to vector<8x128xbf16>
    %c8 = arith.constant 8 : index
    %c0_41 = arith.constant 0 : index
    %161 = vector.load %arg9[%c8, %c0_41] : memref<16x512xbf16, #tpu.memory_space<vmem>>, vector<8x128xbf16>
    tpu.vector_store %arg9[%c8, %c0_41], %160 {strides = array<i32>} : memref<16x512xbf16, #tpu.memory_space<vmem>>, vector<8x128xbf16>,
    %162 = vector.extract_strided_slice %159 {offsets = [8, 0], sizes = [8, 128], strides = [1, 1]} : vector<16x128xbf16> to vector<8x128xbf16>
    %c8_42 = arith.constant 8 : index
    %c128_43 = arith.constant 128 : index
    %163 = vector.load %arg9[%c8_42, %c128_43] : memref<16x512xbf16, #tpu.memory_space<vmem>>, vector<8x128xbf16>
    tpu.vector_store %arg9[%c8_42, %c128_43], %162 {strides = array<i32>} : memref<16x512xbf16, #tpu.memory_space<vmem>>, vector<8x128xbf16>,
    %164 = vector.extract_strided_slice %68 {offsets = [8, 0], sizes = [8, 128], strides = [1, 1]} : vector<16x128xbf16> to vector<8x128xbf16>
    %165 = vector.extract_strided_slice %72 {offsets = [8, 0], sizes = [8, 128], strides = [1, 1]} : vector<16x128xbf16> to vector<8x128xbf16>
    %166 = vector.extract_strided_slice %38 {offsets = [8, 0], sizes = [8, 128], strides = [1, 1]} : vector<16x128xbf16> to vector<8x128xbf16>
    %167 = vector.extract_strided_slice %48 {offsets = [8, 0], sizes = [8, 128], strides = [1, 1]} : vector<16x128xbf16> to vector<8x128xbf16>
    %168 = tpu.concatenate %166, %167 in 0 : vector<8x128xbf16>, vector<8x128xbf16> -> vector<16x128xbf16>
    %cst_44 = arith.constant dense<0.000000e+00> : vector<16x8xf32>
    %169 = tpu.matmul %168, %164, %cst_44 {dimension_numbers = #tpu.dot_dimension_numbers<[1], [1], [0], [0], [0, 0, 1, 0], [], []>} : vector<16x128xbf16>, vector<8x128xbf16>, vector<16x8xf32> -> vector<16x8xf32>
    %170 = arith.addf %169, %94 : vector<16x8xf32>
    %cst_45 = arith.constant dense<0xFF800000> : vector<16xf32>
    %171 = vector.multi_reduction <maximumf>, %170, %cst_45 [1] : vector<16x8xf32> to vector<16xf32>
    %172 = vector.shape_cast %171 : vector<16xf32> to vector<16x1xf32>
    %173 = vector.broadcast %172 : vector<16x1xf32> to vector<16x8xf32>
    %174 = arith.subf %170, %173 : vector<16x8xf32>
    %175 = math.exp %174 : vector<16x8xf32>
    %cst_46 = arith.constant dense<0.000000e+00> : vector<16xf32>
    %176 = vector.multi_reduction <add>, %175, %cst_46 [1] : vector<16x8xf32> to vector<16xf32>
    %177 = vector.shape_cast %176 : vector<16xf32> to vector<16x1xf32>
    %178 = vector.broadcast %177 : vector<16x1xf32> to vector<16x8xf32>
    %179 = arith.divf %175, %178 : vector<16x8xf32>
    %180 = arith.truncf %179 : vector<16x8xf32> to vector<16x8xbf16>
    %cst_47 = arith.constant dense<0.000000e+00> : vector<16x128xf32>
    %181 = tpu.matmul %180, %165, %cst_47 {dimension_numbers = #tpu.dot_dimension_numbers<[1], [0], [0], [1], [0, 0, 1, 1], [], []>} : vector<16x8xbf16>, vector<8x128xbf16>, vector<16x128xf32> -> vector<16x128xf32>
    %182 = arith.truncf %181 : vector<16x128xf32> to vector<16x128xbf16>
    %183 = vector.extract_strided_slice %182 {offsets = [0, 0], sizes = [8, 128], strides = [1, 1]} : vector<16x128xbf16> to vector<8x128xbf16>
    %c8_48 = arith.constant 8 : index
    %c256_49 = arith.constant 256 : index
    %184 = vector.load %arg9[%c8_48, %c256_49] : memref<16x512xbf16, #tpu.memory_space<vmem>>, vector<8x128xbf16>
    tpu.vector_store %arg9[%c8_48, %c256_49], %183 {strides = array<i32>} : memref<16x512xbf16, #tpu.memory_space<vmem>>, vector<8x128xbf16>,
    %185 = vector.extract_strided_slice %182 {offsets = [8, 0], sizes = [8, 128], strides = [1, 1]} : vector<16x128xbf16> to vector<8x128xbf16>
    %c8_50 = arith.constant 8 : index
    %c384_51 = arith.constant 384 : index
    %186 = vector.load %arg9[%c8_50, %c384_51] : memref<16x512xbf16, #tpu.memory_space<vmem>>, vector<8x128xbf16>
    tpu.vector_store %arg9[%c8_50, %c384_51], %185 {strides = array<i32>} : memref<16x512xbf16, #tpu.memory_space<vmem>>, vector<8x128xbf16>,
    %c0_52 = arith.constant 0 : index
    %c0_53 = arith.constant 0 : index
    %187 = vector.load %arg9[%c0_52, %c0_53] : memref<16x512xbf16, #tpu.memory_space<vmem>>, vector<16x512xbf16>
    %c0_54 = arith.constant 0 : index
    %c0_55 = arith.constant 0 : index
    %188 = vector.load %arg5[%c0_54, %c0_55] : memref<512x64xbf16, #tpu.memory_space<vmem>>, vector<512x64xbf16>
    %cst_56 = arith.constant dense<0.000000e+00> : vector<16x64xf32>
    %189 = tpu.matmul %187, %188, %cst_56 {dimension_numbers = #tpu.dot_dimension_numbers<[1], [0], [0], [1], [0, 0, 1, 1], [], []>} : vector<16x512xbf16>, vector<512x64xbf16>, vector<16x64xf32> -> vector<16x64xf32>
    %c0_57 = arith.constant 0 : index
    %c0_58 = arith.constant 0 : index
    %190 = vector.load %arg8[%c0_57, %c0_58] : memref<16x64xf32, #tpu.memory_space<vmem>>, vector<16x64xf32>
    tpu.vector_store %arg8[%c0_57, %c0_58], %189 {strides = array<i32>} : memref<16x64xf32, #tpu.memory_space<vmem>>, vector<16x64xf32>,
    return
  }
  func.func @transform_0(%arg0: i32) -> (i32, i32) {
    %c0_i32 = arith.constant 0 : i32
    %c0_i32_0 = arith.constant 0 : i32
    %c0_i32_1 = arith.constant 0 : i32
    return %c0_i32, %c0_i32_0 : i32, i32
  }
  func.func @transform_1(%arg0: i32) -> (i32, i32) {
    %c0_i32 = arith.constant 0 : i32
    %c0_i32_0 = arith.constant 0 : i32
    %c0_i32_1 = arith.constant 0 : i32
    return %c0_i32, %c0_i32_0 : i32, i32
  }
  func.func @transform_2(%arg0: i32) -> (i32, i32) {
    %c0_i32 = arith.constant 0 : i32
    %c0_i32_0 = arith.constant 0 : i32
    %c0_i32_1 = arith.constant 0 : i32
    return %c0_i32, %c0_i32_0 : i32, i32
  }
  func.func @transform_3(%arg0: i32) -> (i32, i32) {
    %c0_i32 = arith.constant 0 : i32
    %c0_i32_0 = arith.constant 0 : i32
    %c0_i32_1 = arith.constant 0 : i32
    return %c0_i32, %c0_i32_0 : i32, i32
  }
  func.func @transform_4(%arg0: i32) -> (i32, i32) {
    %c0_i32 = arith.constant 0 : i32
    %c0_i32_0 = arith.constant 0 : i32
    %c0_i32_1 = arith.constant 0 : i32
    return %c0_i32, %c0_i32_0 : i32, i32
  }
  func.func @transform_5(%arg0: i32) -> (i32, i32) {
    %c0_i32 = arith.constant 0 : i32
    %c0_i32_0 = arith.constant 0 : i32
    %c0_i32_1 = arith.constant 0 : i32
    return %c0_i32, %c0_i32_0 : i32, i32
  }
  func.func @transform_6(%arg0: i32) -> (i32, i32) {
    %c0_i32 = arith.constant 0 : i32
    %c0_i32_0 = arith.constant 0 : i32
    %c0_i32_1 = arith.constant 0 : i32
    return %c0_i32, %c0_i32_0 : i32, i32
  }
  func.func @transform_7(%arg0: i32) -> (i32, i32) {
    %c0_i32 = arith.constant 0 : i32
    %c0_i32_0 = arith.constant 0 : i32
    %c0_i32_1 = arith.constant 0 : i32
    return %c0_i32, %c0_i32_0 : i32, i32
  }
}

</mosaic_0001>

<bundles_post_ra>
// kernel: tpu_custom_call.1
= control target key start
LH: loop header
LB: loop body
LE: loop exit
PB: predicated region body
PF: predicated region fallthrough
CT: control target
= control target key end

     0   :  { %v1794_v2 = vmov 0   ;;  %vm131_vm0 = vcmask 523264   ;;  %s2260_s0 = inlined_call_operand.vmem [shape: bf16[16,64], index: 0, kind: input, shape index: {}]   ;;  %s2261_s1 = inlined_call_operand.vmem [shape: bf16[64,512], index: 1, kind: input, shape index: {}]   ;;  %s2262_s2 = inlined_call_operand.vmem [shape: bf16[64,256], index: 2, kind: input, shape index: {}]   ;;  %s2263_s3 = inlined_call_operand.vmem [shape: bf16[64,256], index: 3, kind: input, shape index: {}]   ;;  %s2264_s4 = inlined_call_operand.vmem [shape: bf16[512,64], index: 4, kind: input, shape index: {}]   ;;  %s2265_s5 = inlined_call_operand.vmem [shape: f32[16,128], index: 5, kind: input, shape index: {}]   ;;  %s2266_s6 = inlined_call_operand.vmem [shape: f32[16,128], index: 6, kind: input, shape index: {}]   ;;  %s2267_s7 = inlined_call_operand.hbm [shape: f32[16,64], index: 7, kind: output, shape index: {}]  }
   0x1   :  { %v1657_v0 = vld [vmem:[%s2261_s1 + $0x4] ss:$16 sps:$4 sm:$0xff]   ;;  %v1659_v1 = vld [vmem:[%s2261_s1] ss:$16 sps:$4 sm:$0xff]   ;;  %167 = vmatprep.mubr.bf16.mxu0 %v1794_v2  ;;  %210 = vmatprep.mubr.bf16.mxu1 %v1794_v2  ;;  %v1676_v8 = vld [vmem:[%s2261_s1 + $0xc] ss:$16 sps:$4 sm:$0xff]  }
   0x2   :  { %135 = vmatprep.subr.bf16.mxu0 %v1657_v0  ;;  %v1660_v3 = vld [vmem:[%s2261_s1 + $0x24] ss:$16 sps:$4 sm:$0xff]   ;;  %v1662_v4 = vld [vmem:[%s2261_s1 + $0x20] ss:$16 sps:$4 sm:$0xff]   ;;  %v1678_v9 = vld [vmem:[%s2261_s1 + $0x8] ss:$16 sps:$4 sm:$0xff]   ;;  %178 = vmatprep.subr.bf16.mxu1 %v1676_v8 }
   0x3   :  { %136 = vmatpush1.bf16.msra.mxu0 %v1659_v1  ;;  %v1663_v5 = vld [vmem:[%s2261_s1 + $0x44] ss:$16 sps:$4 sm:$0xff]   ;;  %v1665_v6 = vld [vmem:[%s2261_s1 + $0x40] ss:$16 sps:$4 sm:$0xff]   ;;  %179 = vmatpush1.bf16.msra.mxu1 %v1678_v9  ;;  %v1682_v12 = vld [vmem:[%s2261_s1 + $0x2c] ss:$16 sps:$4 sm:$0xff]  }
   0x4   :  { %137 = vmatprep.subr.bf16.mxu0 %v1660_v3  ;;  %v1666_v7 = vld [vmem:[%s2261_s1 + $0x64] ss:$16 sps:$4 sm:$0xff]   ;;  %v1668_v10 = vld [vmem:[%s2261_s1 + $0x60] ss:$16 sps:$4 sm:$0xff]   ;;  %v1684_v13 = vld [vmem:[%s2261_s1 + $0x28] ss:$16 sps:$4 sm:$0xff]   ;;  %180 = vmatprep.subr.bf16.mxu1 %v1682_v12 }
   0x5   :  { %v1672_v11 = vld [vmem:[%s2262_s2 + $0x4] ss:$8 sps:$4 sm:$0xff]   ;;  %v1670_v15 = vld [vmem:[%s2262_s2] ss:$8 sps:$4 sm:$0xff]   ;;  %v1675_v16 = vld [vmem:[%s2262_s2 + $0x14] ss:$8 sps:$4 sm:$0xff]  }
   0x6   :  { %v1884_v14 = vld [vmem:[%s2260_s0] sm:$0xff]   ;;  %v1688_v17 = vld [vmem:[%s2261_s1 + $0x4c] ss:$16 sps:$4 sm:$0xff]   ;;  %v1690_v18 = vld [vmem:[%s2261_s1 + $0x48] ss:$16 sps:$4 sm:$0xff]  }
   0x7   :  { %138 = vmatpush1.bf16.msra.mxu0 %v1662_v4  ;;  %181 = vmatpush1.bf16.msra.mxu1 %v1684_v13  ;;  %v1691_v19 = vld [vmem:[%s2261_s1 + $0x6c] ss:$16 sps:$4 sm:$0xff]   ;;  %v1673_v20 = vld [vmem:[%s2262_s2 + $0x10] ss:$8 sps:$4 sm:$0xff]   ;;  %v1679_v23 = vld [vmem:[%s2262_s2 + $0x20] ss:$8 sps:$4 sm:$0xff]  }
   0x8   :  { %139 = vmatprep.subr.bf16.mxu0 %v1663_v5  ;;  %182 = vmatprep.subr.bf16.mxu1 %v1688_v17  ;;  %v1681_v21 = vld [vmem:[%s2262_s2 + $0x24] ss:$8 sps:$4 sm:$0xff]   ;;  %v1693_v22 = vld [vmem:[%s2261_s1 + $0x68] ss:$16 sps:$4 sm:$0xff]   ;;  %v1687_v24 = vld [vmem:[%s2262_s2 + $0x34] ss:$8 sps:$4 sm:$0xff]  }
   0x9   :  { %v1685_v25 = vld [vmem:[%s2262_s2 + $0x30] ss:$8 sps:$4 sm:$0xff]  }
   0xb   :  { %140 = vmatpush1.bf16.msra.mxu0 %v1665_v6  ;;  %183 = vmatpush1.bf16.msra.mxu1 %v1690_v18 }
   0xc   :  { %141 = vmatprep.subr.bf16.mxu0 %v1666_v7  ;;  %184 = vmatprep.subr.bf16.mxu1 %v1691_v19 }
   0xf   :  { %142 = vmatpush1.bf16.msra.mxu0 %v1668_v10  ;;  %185 = vmatpush1.bf16.msra.mxu1 %v1693_v22 }
  0x10   :  { %269 = vmatprep.subr.bf16.mxu0 %v1672_v11 }
  0x12   :  { %1485 = vmatmul.mubr.msk.bf16.vlgmr.msra.gmra.mrb[0].mxu0 %vm131_vm0, %v1884_v14  ;;  %1486 = vmatmul.mubr.msk.bf16.vlgmr.msra.gmra.mrb[0].mxu1 %vm131_vm0, %v1884_v14 }
  0x13   :  { %270 = vmatpush1.bf16.msra.mxu0 %v1670_v15  ;;  %301 = vmatprep.mubr.bf16.mxu0 %v1794_v2 }
  0x14   :  { %271 = vmatprep.subr.bf16.mxu0 %v1675_v16  ;;  %392 = vmatprep.mubr.bf16.mxu1 %v1794_v2 }
  0x17   :  { %272 = vmatpush1.bf16.msra.mxu0 %v1673_v20 }
  0x18   :  { %273 = vmatprep.subr.bf16.mxu0 %v1681_v21 }
  0x1b   :  { %274 = vmatpush1.bf16.msra.mxu0 %v1679_v23 }
  0x1c   :  { %275 = vmatprep.subr.bf16.mxu0 %v1687_v24 }
  0x1f   :  { %276 = vmatpush1.bf16.msra.mxu0 %v1685_v25 }
  0x22   :  { %1495 = vmatmul.mubr.msk.bf16.vlgmr.msra.gmra.mrb[4].mxu0 %vm131_vm0, %v1884_v14 }
  0x23   :  { %12 = vsyncpa [#allocation4], 0  ;;  %s1795_s1 = smov 64   ;;  %v1796_v43 = vmov 0.0   ;;  %vm1797_vm1 = vmmov 0   ;;  %v2003_v55 = vld [vmem:[%s2266_s6] sm:$0xff] }
  0x24   :  { %1601 = vmatprep.subr.bf16.mxu0 %v1796_v43  ;;  %1603 = vmatprep.mubr.msk.bf16.mxu0 %vm1797_vm1, %v1796_v43  ;;  %v2008_v57 = vld [vmem:[%s2265_s5] sm:$0xff]  ;;  %v2013_v58 = vld [vmem:[%s2265_s5 + $0x8] sm:$0xff]  ;;  %vm606_vm2 = vcmask 1043456   ;;  %vm652_vm5 = vcmask 64512  }
  0x25   :  { %v2019_v60 = vld [vmem:[%s2266_s6 + $0x8] sm:$0xff] }
  0xe5   :  { %v1925_v26 = vpop.f32.mrb[0].mxu0  ;;  %v1944_v32 = vpop.f32.mrb[0].mxu1 }
  0xe6   :  { %421 = vrot.lane.b32.xlu0 %v1925_v26, %s1795_s1  ;;  %v1929_v27 = vpop.f32.mrb[1].mxu0  ;;  %v409_v30 = vsub.f32 0.0, %v1925_v26  ;;  %v1946_v33 = vpop.f32.mrb[1].mxu1  ;;  %v463_v49 = vsub.f32 0.0, %v1944_v32  ;;  %v407_v0 = vmul.f32 %v2008_v57, %v1925_v26 }
  0xe7   :  { %v1931_v28 = vpop.f32.mrb[2].mxu0  ;;  %v436_v34 = vsub.f32 0.0, %v1929_v27  ;;  %v1950_v35 = vpop.f32.mrb[2].mxu1  ;;  %v490_v47 = vsub.f32 0.0, %v1946_v33  ;;  %v434_v10 = vmul.f32 %v2008_v57, %v1929_v27 }
  0xe8   :  { %423 = vrot.lane.b32.xlu1 %v1931_v28, %s1795_s1  ;;  %v1935_v29 = vpop.f32.mrb[3].mxu0  ;;  %v410_v31 = vsub.f32 0.0, %v1931_v28  ;;  %v1952_v36 = vpop.f32.mrb[3].mxu1  ;;  %v464_v50 = vsub.f32 0.0, %v1950_v35  ;;  %v408_v1 = vmul.f32 %v2013_v58, %v1931_v28 }
  0xe9   :  { %v437_v37 = vsub.f32 0.0, %v1935_v29  ;;  %v491_v46 = vsub.f32 0.0, %v1952_v36  ;;  %v435_v11 = vmul.f32 %v2013_v58, %v1935_v29 }
  0xea   :  { %448 = vrot.lane.b32.xlu0 %v1929_v27, %s1795_s1 }
  0xec   :  { %450 = vrot.lane.b32.xlu1 %v1935_v29, %s1795_s1 }
  0xee   :  { %413 = vrot.lane.b32.xlu0 %v409_v30, %s1795_s1 }
  0xf0   :  { %415 = vrot.lane.b32.xlu1 %v410_v31, %s1795_s1 }
  0xf2   :  { %440 = vrot.lane.b32.xlu0 %v436_v34, %s1795_s1 }
  0xf4   :  { %442 = vrot.lane.b32.xlu1 %v437_v37, %s1795_s1 }
  0xf5   :  { %v1957_v38 = vpop.f32.mrb[4].mxu0 }
  0xf6   :  { %v1959_v39 = vpop.f32.mrb[5].mxu0  ;;  %v517_v42 = vsub.f32 0.0, %v1957_v38  ;;  %v515_v37 = vmul.f32 %v2008_v57, %v1957_v38 }
  0xf7   :  { %556 = vrot.lane.b32.xlu0 %v1959_v39, %s1795_s1  ;;  %v1963_v40 = vpop.f32.mrb[6].mxu0  ;;  %v544_v44 = vsub.f32 0.0, %v1959_v39 }
  0xf8   :  { %529 = vrot.lane.b32.xlu1 %v1957_v38, %s1795_s1  ;;  %v1967_v41 = vpop.f32.mrb[7].mxu0  ;;  %v518_v45 = vsub.f32 0.0, %v1963_v40 }
  0xf9   :  { %v545_v48 = vsub.f32 0.0, %v1967_v41 }
  0xfb   :  { %521 = vrot.lane.b32.xlu0 %v517_v42, %s1795_s1  ;;  %v516_v42 = vmul.f32 %v2013_v58, %v1963_v40 }
  0xfc   :  { %531 = vrot.lane.b32.xlu1 %v1963_v40, %s1795_s1 }
  0xff   :  { %548 = vrot.lane.b32.xlu0 %v544_v44, %s1795_s1 }
 0x100   :  { %558 = vrot.lane.b32.xlu1 %v1967_v41, %s1795_s1 }
 0x103   :  { %523 = vrot.lane.b32.xlu0 %v518_v45, %s1795_s1 }
 0x104   :  { %496 = vrot.lane.b32.xlu1 %v491_v46, %s1795_s1 }
 0x107   :  { %494 = vrot.lane.b32.xlu0 %v490_v47, %s1795_s1 }
 0x108   :  { %504 = vrot.lane.b32.xlu1 %v1952_v36, %s1795_s1 }
 0x10b   :  { %502 = vrot.lane.b32.xlu0 %v1946_v33, %s1795_s1 }
 0x10c   :  { %550 = vrot.lane.b32.xlu1 %v545_v48, %s1795_s1 }
 0x10f   :  { %467 = vrot.lane.b32.xlu0 %v463_v49, %s1795_s1 }
 0x110   :  { %469 = vrot.lane.b32.xlu1 %v464_v50, %s1795_s1 }
 0x113   :  { %475 = vrot.lane.b32.xlu0 %v1944_v32, %s1795_s1 }
 0x114   :  { %477 = vrot.lane.b32.xlu1 %v1950_v35, %s1795_s1 }
 0x158   :  { %v422_v51 = vpop.permute.xlu0 %421 }
 0x15a   :  { %v424_v52 = vpop.permute.xlu1 %423 }
 0x15c   :  { %v449_v53 = vpop.permute.xlu0 %448 }
 0x15e   :  { %v451_v54 = vpop.permute.xlu1 %450 }
 0x160   :  { %v414_v56 = vpop.permute.xlu0 %413 }
 0x161   :  { %v427_v59 = vsel %vm131_vm0, %v414_v56, %v422_v51  ;;  %v488_v56 = vmul.f32 %v2008_v57, %v1946_v33 }
 0x162   :  { %v429_v61 = vmul.f32 %v427_v59, %v2003_v55  ;;  %v416_v62 = vpop.permute.xlu1 %415  ;;  %v489_v59 = vmul.f32 %v2013_v58, %v1952_v36 }
 0x163   :  { %v428_v63 = vsel %vm131_vm0, %v416_v62, %v424_v52 }
 0x164   :  { %v430_v2 = vmul.f32 %v428_v63, %v2019_v60  ;;  %v441_v3 = vpop.permute.xlu0 %440  ;;  %v431_v5 = vadd.f32 %v429_v61, %v407_v0  ;;  %v542_v63 = vmul.f32 %v2008_v57, %v1959_v39  ;;  %v543_v0 = vmul.f32 %v2013_v58, %v1967_v41 }
 0x165   :  { %v454_v4 = vsel %vm131_vm0, %v441_v3, %v449_v53  ;;  %v461_v41 = vmul.f32 %v2008_v57, %v1944_v32  ;;  %v1696_v57 = vld [vmem:[%s2263_s3 + $0x4] ss:$8 sps:$4 sm:$0xff]  }
 0x166   :  { %v432_v6 = vadd.f32 %v430_v2, %v408_v1  ;;  %v456_v7 = vmul.f32 %v454_v4, %v2003_v55  ;;  %v443_v8 = vpop.permute.xlu1 %442  ;;  %360 = vmatprep.subr.bf16.mxu1 %v1696_v57 }
 0x167   :  { %v455_v9 = vsel %vm131_vm0, %v443_v8, %v451_v54 }
 0x168   :  { %v433_v12 = vpack.c.bf16 %v432_v6, %v431_v5  ;;  %v457_v13 = vmul.f32 %v455_v9, %v2019_v60  ;;  %v458_v16 = vadd.f32 %v456_v7, %v434_v10 }
 0x169   :  { %v557_v15 = vpop.permute.xlu0 %556 }
 0x16a   :  { %v459_v17 = vadd.f32 %v457_v13, %v435_v11  ;;  %v530_v18 = vpop.permute.xlu1 %529  ;;  %v853_v20 = vrot.slane %v433_v12, 4 }
 0x16c   :  { %v460_v19 = vpack.c.bf16 %v459_v17, %v458_v16 }
 0x16d   :  { %v522_v21 = vpop.permute.xlu0 %521 }
 0x16e   :  { %v532_v22 = vpop.permute.xlu1 %531  ;;  %v605_v23 = vrot.slane %v460_v19, 4  ;;  %v2037_v24 = vsel %vm606_vm2, %v853_v20, %v460_v19  ;;  %v535_v27 = vsel %vm131_vm0, %v522_v21, %v530_v18 }
 0x16f   :  { %v537_v29 = vmul.f32 %v535_v27, %v2003_v55 }
 0x170   :  { %v609_v25 = vsel %vm606_vm2, %v433_v12, %v605_v23  ;;  %v462_v12 = vmul.f32 %v2013_v58, %v1950_v35  ;;  %v1699_v58 = vld [vmem:[%s2263_s3 + $0x14] ss:$8 sps:$4 sm:$0xff]   ;;  %v1700_v23 = vld [vmem:[%s2263_s3 + $0x20] ss:$8 sps:$4 sm:$0xff]  }
 0x171   :  { %v549_v26 = vpop.permute.xlu0 %548  ;;  %v539_v45 = vadd.f32 %v537_v29, %v515_v37 }
 0x172   :  { %v559_v28 = vpop.permute.xlu1 %558  ;;  %v562_v49 = vsel %vm131_vm0, %v549_v26, %v557_v15  ;;  %v571_v26 = vlaneseq }
 0x173   :  { %v564_v38 = vmul.f32 %v562_v49, %v2003_v55 }
 0x174   :  { %v572_v27 = vshrl.u32 %v571_v26, 7 }
 0x175   :  { %v524_v30 = vpop.permute.xlu0 %523  ;;  %v566_v5 = vadd.f32 %v564_v38, %v542_v63 }
 0x176   :  { %v536_v31 = vsel %vm131_vm0, %v524_v30, %v532_v22  ;;  %v497_v34 = vpop.permute.xlu1 %496  ;;  %v1702_v22 = vld [vmem:[%s2263_s3 + $0x24] ss:$8 sps:$4 sm:$0xff]   ;;  %v578_v29 = vand.u32 7, %v572_v27  ;;  %v599_v30 = vand.u32 127, %v571_v26 }
 0x177   :  { %v538_v44 = vmul.f32 %v536_v31, %v2019_v60 }
 0x178   :  { %vm600_vm3 = vcmp.le.s32.totalorder %v599_v30, %v578_v29 }
 0x179   :  { %v540_v46 = vadd.f32 %v538_v44, %v516_v42  ;;  %v495_v47 = vpop.permute.xlu0 %494 }
 0x17a   :  { %v505_v48 = vpop.permute.xlu1 %504 }
 0x17b   :  { %v541_v50 = vpack.c.bf16 %v540_v46, %v539_v45  ;;  %v509_v51 = vsel %vm131_vm0, %v497_v34, %v505_v48  ;;  %v1798_v34 = vmov -1e+30  }
 0x17c   :  { %v511_v52 = vmul.f32 %v509_v51, %v2019_v60  ;;  %v602_v37 = vsel %vm600_vm3, 0.0, %v1798_v34 }
 0x17d   :  { %v503_v53 = vpop.permute.xlu0 %502  ;;  %1602 = vmatpush3.bf16.xpose.msra.mxu0 %v541_v50  ;;  %v859_v20 = vrot.slane %v541_v50, 4 }
 0x17e   :  { %v508_v54 = vsel %vm131_vm0, %v495_v47, %v503_v53  ;;  %v551_v40 = vpop.permute.xlu1 %550  ;;  %1613 = vmatprep.subr.bf16.mxu0 %v1796_v43  ;;  %v513_v2 = vadd.f32 %v511_v52, %v489_v59 }
 0x17f   :  { %v510_v61 = vmul.f32 %v508_v54, %v2003_v55  ;;  %v563_v62 = vsel %vm131_vm0, %v551_v40, %v559_v28  ;;  %v573_v28 = vadd.s32 8, %v572_v27 }
 0x180   :  { %v565_v1 = vmul.f32 %v563_v62, %v2019_v60 }
 0x181   :  { %v512_v3 = vadd.f32 %v510_v61, %v488_v56  ;;  %v468_v4 = vpop.permute.xlu0 %467  ;;  %v585_v31 = vand.u32 7, %v573_v28 }
 0x182   :  { %v567_v33 = vadd.f32 %v565_v1, %v543_v0  ;;  %v470_v6 = vpop.permute.xlu1 %469 }
 0x183   :  { %v514_v7 = vpack.c.bf16 %v513_v2, %v512_v3  ;;  %vm601_vm4 = vcmp.le.s32.totalorder %v599_v30, %v585_v31 }
 0x184   :  { %v568_v36 = vpack.c.bf16 %v567_v33, %v566_v5  ;;  %1604 = vmatmul.mubr.bf16.vlgmr.msra.gmra.mrb[8].mxu0 %v609_v25  ;;  %v1703_v25 = vld [vmem:[%s2263_s3 + $0x30] ss:$8 sps:$4 sm:$0xff]   ;;  %v603_v44 = vsel %vm601_vm4, 0.0, %v1798_v34 }
 0x185   :  { %v476_v8 = vpop.permute.xlu0 %475  ;;  %1615 = vmatprep.mubr.msk.bf16.mxu0 %vm1797_vm1, %v1796_v43  ;;  %v730_v18 = vrot.slane %v514_v7, 4 }
 0x186   :  { %v481_v39 = vsel %vm131_vm0, %v468_v4, %v476_v8  ;;  %v478_v9 = vpop.permute.xlu1 %477  ;;  %1614 = vmatpush3.bf16.xpose.msra.mxu0 %v568_v36  ;;  %v987_v35 = vrot.slane %v568_v36, 4 }
 0x187   :  { %v483_v10 = vmul.f32 %v481_v39, %v2003_v55  ;;  %v482_v11 = vsel %vm131_vm0, %v470_v6, %v478_v9  ;;  %1625 = vmatprep.subr.bf16.mxu0 %v1796_v43  ;;  %v1694_v55 = vld [vmem:[%s2263_s3] ss:$8 sps:$4 sm:$0xff]  }
 0x188   :  { %v484_v13 = vmul.f32 %v482_v11, %v2019_v60  ;;  %361 = vmatpush1.bf16.msra.mxu1 %v1694_v55  ;;  %v1697_v60 = vld [vmem:[%s2263_s3 + $0x10] ss:$8 sps:$4 sm:$0xff]  }
 0x189   :  { %v485_v15 = vadd.f32 %v483_v10, %v461_v41  ;;  %362 = vmatprep.subr.bf16.mxu1 %v1699_v58 }
 0x18a   :  { %v486_v16 = vadd.f32 %v484_v13, %v462_v12 }
 0x18c   :  { %v487_v17 = vpack.c.bf16 %v486_v16, %v485_v15  ;;  %363 = vmatpush1.bf16.msra.mxu1 %v1697_v60 }
 0x18d   :  { %364 = vmatprep.subr.bf16.mxu1 %v1702_v22 }
 0x18e   :  { %v733_v19 = vsel %vm606_vm2, %v487_v17, %v730_v18  ;;  %v981_v21 = vrot.slane %v487_v17, 4 }
 0x18f   :  { %1616 = vmatmul.mubr.bf16.vlgmr.msra.gmra.mrb[12].mxu0 %v733_v19 }
 0x190   :  { %1626 = vmatpush3.bf16.xpose.msra.mxu0 %v859_v20  ;;  %1627 = vmatprep.mubr.msk.bf16.mxu0 %vm1797_vm1, %v1796_v43  ;;  %v984_v32 = vsel %vm606_vm2, %v981_v21, %v514_v7 }
 0x191   :  { %1637 = vmatprep.subr.bf16.mxu0 %v1796_v43  ;;  %365 = vmatpush1.bf16.msra.mxu1 %v1700_v23 }
 0x197   :  { %1628 = vmatmul.mubr.bf16.vlgmr.msra.gmra.mrb[16].mxu0 %v2037_v24  ;;  %v1705_v24 = vld [vmem:[%s2263_s3 + $0x34] ss:$8 sps:$4 sm:$0xff]  }
 0x198   :  { %1638 = vmatpush3.bf16.xpose.msra.mxu0 %v987_v35  ;;  %1639 = vmatprep.mubr.msk.bf16.mxu0 %vm1797_vm1, %v1796_v43 }
 0x199   :  { %366 = vmatprep.subr.bf16.mxu1 %v1705_v24 }
 0x19a   :  { %367 = vmatpush1.bf16.msra.mxu1 %v1703_v25 }
 0x19b   :  { %1607 = vmatprep.subr.bf16.mxu1 %v1796_v43 }
 0x19d   :  { %1504 = vmatmul.mubr.msk.bf16.vlgmr.msra.gmra.mrb[4].mxu1 %vm131_vm0, %v1884_v14 }
 0x19e   :  { %1609 = vmatprep.mubr.msk.bf16.mxu1 %vm1797_vm1, %v1796_v43 }
 0x19f   :  { %1640 = vmatmul.mubr.bf16.vlgmr.msra.gmra.mrb[20].mxu0 %v984_v32 }
 0x257   :  { %v645_v42 = vpop.f32.mrb[8].mxu0 }
 0x258   :  { %v646_v45 = vadd.f32 %v645_v42, %v602_v37  ;;  %v1605_v46 = vpop.f32.mrb[9].mxu0 }
 0x259   :  { %v648_v47 = vpop.f32.mrb[10].mxu0 }
 0x25a   :  { %v649_v14 = vadd.f32 %v648_v47, %v603_v44  ;;  %v1606_v48 = vpop.f32.mrb[11].mxu0  ;;  %v653_v49 = vsel %vm652_vm5, %v646_v45, -inf }
 0x25b   :  { %654 = vmax.xlane.f32.xlu0 %v653_v49 }
 0x25c   :  { %v656_v50 = vsel %vm652_vm5, %v649_v14, -inf }
 0x25d   :  { %657 = vmax.xlane.f32.xlu1 %v656_v50 }
 0x262   :  { %v769_v51 = vpop.f32.mrb[12].mxu0 }
 0x263   :  { %v770_v52 = vadd.f32 %v769_v51, %v602_v37  ;;  %v1617_v53 = vpop.f32.mrb[13].mxu0 }
 0x264   :  { %v772_v38 = vpop.f32.mrb[14].mxu0 }
 0x265   :  { %v773_v54 = vadd.f32 %v772_v38, %v603_v44  ;;  %v1618_v40 = vpop.f32.mrb[15].mxu0  ;;  %v776_v56 = vsel %vm652_vm5, %v770_v52, -inf }
 0x266   :  { %777 = vmax.xlane.f32.xlu0 %v776_v56 }
 0x267   :  { %v779_v59 = vsel %vm652_vm5, %v773_v54, -inf }
 0x26a   :  { %780 = vmax.xlane.f32.xlu0 %v779_v59  ;;  %v895_v61 = vpop.f32.mrb[16].mxu0 }
 0x26b   :  { %v896_v62 = vadd.f32 %v895_v61, %v602_v37  ;;  %v1629_v63 = vpop.f32.mrb[17].mxu0 }
 0x26c   :  { %v898_v0 = vpop.f32.mrb[18].mxu0 }
 0x26d   :  { %v899_v1 = vadd.f32 %v898_v0, %v603_v44  ;;  %v1630_v2 = vpop.f32.mrb[19].mxu0  ;;  %v902_v3 = vsel %vm652_vm5, %v896_v62, -inf }
 0x26e   :  { %903 = vmax.xlane.f32.xlu1 %v902_v3 }
 0x26f   :  { %v905_v4 = vsel %vm652_vm5, %v899_v1, -inf }
 0x270   :  { %906 = vmax.xlane.f32.xlu0 %v905_v4  ;;  %v394_v48 = vpop.f32.mrb[4].mxu1 }
 0x271   :  { %v396_v49 = vpop.f32.mrb[5].mxu1 }
 0x272   :  { %v1023_v5 = vpop.f32.mrb[20].mxu0  ;;  %v398_v50 = vpop.f32.mrb[6].mxu1 }
 0x273   :  { %v1024_v33 = vadd.f32 %v1023_v5, %v602_v37  ;;  %v1641_v6 = vpop.f32.mrb[21].mxu0  ;;  %v400_v40 = vpop.f32.mrb[7].mxu1 }
 0x274   :  { %v1026_v7 = vpop.f32.mrb[22].mxu0  ;;  %v570_v59 = vpack.c.bf16 %v400_v40, %v396_v49  ;;  %v1727_v49 = vld [vmem:[%s2264_s4 + $0xe0] sm:$0xff]   ;;  %v1734_v40 = vld [vmem:[%s2264_s4 + $0xf0] sm:$0xff]  }
 0x275   :  { %v1027_v36 = vadd.f32 %v1026_v7, %v603_v44  ;;  %v1642_v8 = vpop.f32.mrb[23].mxu0  ;;  %v1030_v39 = vsel %vm652_vm5, %v1024_v33, -inf }
 0x276   :  { %1031 = vmax.xlane.f32.xlu1 %v1030_v39  ;;  %v803_v5 = vsel %vm606_vm2, %v570_v59, 0 }
 0x277   :  { %v1033_v9 = vsel %vm652_vm5, %v1027_v36, -inf }
 0x278   :  { %1034 = vmax.xlane.f32.xlu0 %v1033_v9 }
 0x2e8   :  { %v655_v41 = vpop.xlane.xlu0 %654 }
 0x2e9   :  { %v659_v10 = vsub.f32 %v646_v45, %v655_v41 }
 0x2ea   :  { %v658_v11 = vpop.xlane.xlu1 %657 }
 0x2eb   :  { %v661_v12 = vmul.f32 1.442695, %v659_v10  ;;  %v660_v13 = vsub.f32 %v649_v14, %v658_v11 }
 0x2ed   :  { %1738 = vpow2.f32 %v661_v12  ;;  %v663_v15 = vmul.f32 1.442695, %v660_v13 }
 0x2ef   :  { %1740 = vpow2.f32 %v663_v15 }
 0x2f3   :  { %v778_v16 = vpop.xlane.xlu0 %777 }
 0x2f4   :  { %v782_v17 = vsub.f32 %v770_v52, %v778_v16  ;;  %v569_v52 = vpack.c.bf16 %v398_v50, %v394_v48  ;;  %v1726_v48 = vld [vmem:[%s2264_s4 + $0x70] sm:$0xff]  }
 0x2f5   :  { %v1728_v50 = vld [vmem:[%s2264_s4 + $0x30] sm:$0xff]  }
 0x2f6   :  { %v784_v18 = vmul.f32 1.442695, %v782_v17  ;;  %v926_v39 = vrot.slane %v569_v52, 4 }
 0x2f7   :  { %v1739_v19 = vpop.eup %1738  ;;  %v781_v20 = vpop.xlane.xlu0 %780 }
 0x2f8   :  { %1742 = vpow2.f32 %v784_v18  ;;  %v783_v21 = vsub.f32 %v773_v54, %v781_v20  ;;  %v665_v32 = vsel %vm652_vm5, %v1739_v19, 0.0  ;;  %v680_v54 = vsel %vm606_vm2, %v569_v52, 0  ;;  %v1730_v52 = vld [vmem:[%s2264_s4 + $0x78] sm:$0xff]  }
 0x2f9   :  { %v1741_v35 = vpop.eup %1740  ;;  %666 = vadd.xlane.f32.xlu1 %v665_v32  ;;  %1608 = vmatpush3.bf16.msra.mxu1 %v680_v54  ;;  %v931_v15 = vsel %vm606_vm2, %v926_v39, 0  ;;  %v1054_v18 = vrot.slane %v570_v59, 4  ;;  %v1733_v54 = vld [vmem:[%s2264_s4 + $0xa8] sm:$0xff]   ;;  %v1736_v59 = vld [vmem:[%s2264_s4 + $0xf8] sm:$0xff]  }
 0x2fa   :  { %v786_v55 = vmul.f32 1.442695, %v783_v21  ;;  %v668_v57 = vsel %vm652_vm5, %v1741_v35, 0.0  ;;  %1619 = vmatprep.subr.bf16.mxu1 %v1796_v43 }
 0x2fb   :  { %v904_v58 = vpop.xlane.xlu1 %903  ;;  %669 = vadd.xlane.f32.xlu0 %v668_v57  ;;  %v1059_v32 = vsel %vm606_vm2, %v1054_v18, 0 }
 0x2fc   :  { %1744 = vpow2.f32 %v786_v55  ;;  %v908_v60 = vsub.f32 %v896_v62, %v904_v58 }
 0x2fd   :  { %v907_v22 = vpop.xlane.xlu0 %906 }
 0x2fe   :  { %v910_v23 = vmul.f32 1.442695, %v908_v60  ;;  %v909_v24 = vsub.f32 %v899_v1, %v907_v22  ;;  %v1706_v60 = vld [vmem:[%s2264_s4 + $0x40] sm:$0xff]  }
 0x2ff   :  { %v1707_v22 = vld [vmem:[%s2264_s4] sm:$0xff]   ;;  %1557 = vmatprep.subr.bf16.mxu0 %v1706_v60 }
 0x300   :  { %1746 = vpow2.f32 %v910_v23  ;;  %v912_v25 = vmul.f32 1.442695, %v909_v24  ;;  %1558 = vmatpush3.bf16.msra.mxu0 %v1707_v22  ;;  %v1708_v23 = vld [vmem:[%s2264_s4 + $0x48] sm:$0xff]   ;;  %v1710_v24 = vld [vmem:[%s2264_s4 + $0x50] sm:$0xff]  }
 0x301   :  { %1559 = vmatprep.subr.bf16.mxu0 %v1708_v23 }
 0x302   :  { %v1743_v26 = vpop.eup %1742  ;;  %1748 = vpow2.f32 %v912_v25  ;;  %v1711_v25 = vld [vmem:[%s2264_s4 + $0xc0] sm:$0xff]  }
 0x303   :  { %v1032_v27 = vpop.xlane.xlu1 %1031  ;;  %v788_v28 = vsel %vm652_vm5, %v1743_v26, 0.0 }
 0x304   :  { %v1036_v29 = vsub.f32 %v1024_v33, %v1032_v27  ;;  %789 = vadd.xlane.f32.xlu1 %v788_v28  ;;  %v1713_v27 = vld [vmem:[%s2264_s4 + $0x80] sm:$0xff]   ;;  %v1714_v28 = vld [vmem:[%s2264_s4 + $0x58] sm:$0xff]  }
 0x305   :  { %v1035_v30 = vpop.xlane.xlu0 %1034 }
 0x306   :  { %v1745_v31 = vpop.eup %1744  ;;  %v1038_v34 = vmul.f32 1.442695, %v1036_v29  ;;  %v1037_v37 = vsub.f32 %v1027_v36, %v1035_v30  ;;  %v1715_v29 = vld [vmem:[%s2264_s4 + $0xc8] sm:$0xff]   ;;  %v1716_v30 = vld [vmem:[%s2264_s4 + $0x18] sm:$0xff]  }
 0x307   :  { %v791_v42 = vsel %vm652_vm5, %v1745_v31, 0.0 }
 0x308   :  { %1750 = vpow2.f32 %v1038_v34  ;;  %v1040_v44 = vmul.f32 1.442695, %v1037_v37  ;;  %792 = vadd.xlane.f32.xlu0 %v791_v42  ;;  %v1718_v34 = vld [vmem:[%s2264_s4 + $0x60] sm:$0xff]   ;;  %v1719_v37 = vld [vmem:[%s2264_s4 + $0xd0] sm:$0xff]  }
 0x309   :  { %v1720_v42 = vld [vmem:[%s2264_s4 + $0x20] sm:$0xff]  }
 0x30a   :  { %v2125_v45 = vpop.eup %1746  ;;  %1752 = vpow2.f32 %v1040_v44  ;;  %v1721_v44 = vld [vmem:[%s2264_s4 + $0x90] sm:$0xff]  }
 0x30b   :  { %v914_v46 = vsel %vm652_vm5, %v2125_v45, 0.0 }
 0x30c   :  { %v1749_v47 = vpop.eup %1748  ;;  %915 = vadd.xlane.f32.xlu1 %v914_v46  ;;  %v1723_v46 = vld [vmem:[%s2264_s4 + $0xd8] sm:$0xff]  }
 0x30d   :  { %v917_v14 = vsel %vm652_vm5, %v1749_v47, 0.0 }
 0x30e   :  { %918 = vadd.xlane.f32.xlu0 %v917_v14  ;;  %v1725_v14 = vld [vmem:[%s2264_s4 + $0x98] sm:$0xff]  }
 0x312   :  { %v1751_v51 = vpop.eup %1750 }
 0x313   :  { %v1042_v53 = vsel %vm652_vm5, %v1751_v51, 0.0 }
 0x314   :  { %v1753_v38 = vpop.eup %1752  ;;  %1043 = vadd.xlane.f32.xlu1 %v1042_v53  ;;  %v1731_v53 = vld [vmem:[%s2264_s4 + $0xe8] sm:$0xff]  }
 0x315   :  { %v1045_v56 = vsel %vm652_vm5, %v1753_v38, 0.0 }
 0x316   :  { %1046 = vadd.xlane.f32.xlu0 %v1045_v56  ;;  %v1735_v56 = vld [vmem:[%s2264_s4 + $0xb0] sm:$0xff]  }
 0x386   :  { %v667_v61 = vpop.xlane.xlu1 %666 }
 0x387   :  { %1754 = vrcp.f32 %v667_v61  ;;  %v1737_v61 = vld [vmem:[%s2264_s4 + $0xb8] sm:$0xff]  }
 0x388   :  { %v670_v62 = vpop.xlane.xlu0 %669 }
 0x389   :  { %1756 = vrcp.f32 %v670_v62 }
 0x391   :  { %v1755_v63 = vpop.eup %1754  ;;  %v790_v0 = vpop.xlane.xlu1 %789 }
 0x392   :  { %v672_v2 = vmul.f32 %v1755_v63, %v1739_v19  ;;  %1758 = vrcp.f32 %v790_v0 }
 0x393   :  { %v1757_v1 = vpop.eup %1756 }
 0x394   :  { %v674_v3 = vmul.f32 %v1757_v1, %v1741_v35 }
 0x395   :  { %v793_v4 = vpop.xlane.xlu0 %792 }
 0x396   :  { %1760 = vrcp.f32 %v793_v4  ;;  %v675_v33 = vpack.c.bf16 %v674_v3, %v672_v2 }
 0x398   :  { %1610 = vmatmul.mubr.msk.bf16.vlgmr.msra.gmra.mrb[8].mxu1 %vm652_vm5, %v675_v33 }
 0x399   :  { %1620 = vmatpush3.bf16.msra.mxu1 %v803_v5  ;;  %v916_v6 = vpop.xlane.xlu1 %915  ;;  %1621 = vmatprep.mubr.msk.bf16.mxu1 %vm1797_vm1, %v1796_v43 }
 0x39a   :  { %1631 = vmatprep.subr.bf16.mxu1 %v1796_v43  ;;  %1762 = vrcp.f32 %v916_v6 }
 0x39b   :  { %v919_v7 = vpop.xlane.xlu0 %918 }
 0x39c   :  { %1764 = vrcp.f32 %v919_v7  ;;  %v1759_v36 = vpop.eup %1758 }
 0x39d   :  { %v795_v9 = vmul.f32 %v1759_v36, %v1743_v26  ;;  %v1712_v26 = vld [vmem:[%s2264_s4 + $0x10] sm:$0xff]  }
 0x3a0   :  { %v1761_v8 = vpop.eup %1760 }
 0x3a1   :  { %v797_v41 = vmul.f32 %v1761_v8, %v1745_v31  ;;  %v1044_v10 = vpop.xlane.xlu1 %1043  ;;  %v1717_v31 = vld [vmem:[%s2264_s4 + $0x88] sm:$0xff]  }
 0x3a2   :  { %1766 = vrcp.f32 %v1044_v10 }
 0x3a3   :  { %v1047_v11 = vpop.xlane.xlu0 %1046  ;;  %v798_v12 = vpack.c.bf16 %v797_v41, %v795_v9 }
 0x3a4   :  { %1768 = vrcp.f32 %v1047_v11  ;;  %v1763_v13 = vpop.eup %1762 }
 0x3a5   :  { %1622 = vmatmul.mubr.msk.bf16.vlgmr.msra.gmra.mrb[12].mxu1 %vm652_vm5, %v798_v12  ;;  %v921_v19 = vmul.f32 %v1763_v13, %v2125_v45  ;;  %v1722_v45 = vld [vmem:[%s2264_s4 + $0x68] sm:$0xff]  }
 0x3a6   :  { %v1765_v16 = vpop.eup %1764  ;;  %1632 = vmatpush3.bf16.msra.mxu1 %v931_v15  ;;  %1633 = vmatprep.mubr.msk.bf16.mxu1 %vm1797_vm1, %v1796_v43 }
 0x3a7   :  { %v923_v17 = vmul.f32 %v1765_v16, %v1749_v47  ;;  %1643 = vmatprep.subr.bf16.mxu1 %v1796_v43  ;;  %v1724_v47 = vld [vmem:[%s2264_s4 + $0x28] sm:$0xff]  }
 0x3a9   :  { %v924_v20 = vpack.c.bf16 %v923_v17, %v921_v19 }
 0x3ac   :  { %v1767_v21 = vpop.eup %1766 }
 0x3ad   :  { %1634 = vmatmul.mubr.msk.bf16.vlgmr.msra.gmra.mrb[16].mxu1 %vm652_vm5, %v924_v20  ;;  %v1049_v57 = vmul.f32 %v1767_v21, %v1751_v51  ;;  %v1729_v51 = vld [vmem:[%s2264_s4 + $0xa0] sm:$0xff]  }
 0x3ae   :  { %v1769_v35 = vpop.eup %1768  ;;  %1644 = vmatpush3.bf16.msra.mxu1 %v1059_v32  ;;  %1645 = vmatprep.mubr.msk.bf16.mxu1 %vm1797_vm1, %v1796_v43  ;;  %v1709_v43 = vld [vmem:[%s2264_s4 + $0x8] sm:$0xff]  }
 0x3af   :  { %v1051_v55 = vmul.f32 %v1769_v35, %v1753_v38  ;;  %1560 = vmatpush3.bf16.msra.mxu0 %v1709_v43  ;;  %1579 = vmatprep.subr.bf16.mxu1 %v1711_v25  ;;  %v1732_v38 = vld [vmem:[%s2264_s4 + $0x38] sm:$0xff]   ;;  %s1799_s4 = smov [#allocation3]  }
 0x3b0   :  { %1561 = vmatprep.subr.bf16.mxu0 %v1710_v24  ;;  %s1457_s27 = sshll.u32 %s1799_s4, 4  ;;  %s1458_s27 = int_to_ptr.vmem [resolvable:$true] %s1457_s27 }
 0x3b1   :  { %v1052_v58 = vpack.c.bf16 %v1051_v55, %v1049_v57  ;;  %s1770_s28 = scalar_lea.vmem %s1458_s27, 256  ;;  %p1775_p1 = scmp.lt.s32.totalorder %s1458_s27, %s1458_s27 }
 0x3b2   :  { %p1771_p0 = scmp.ne.s32.totalorder %s1458_s27, %s1770_s28  ;;  %p1776_p2 = scmp.lt.s32.totalorder %s1770_s28, %s1770_s28 }
 0x3b3   :  { %1562 = vmatpush3.bf16.msra.mxu0 %v1712_v26 }
 0x3b4   :  { %1563 = vmatprep.subr.bf16.mxu0 %v1714_v28  ;;  %p1777_p3 = por %p1776_p2, %p1775_p1 }
 0x3b5   :  { %1646 = vmatmul.mubr.msk.bf16.vlgmr.msra.gmra.mrb[20].mxu1 %vm652_vm5, %v1052_v58 }
 0x3b6   :  { %1580 = vmatpush3.bf16.msra.mxu1 %v1713_v27  ;;  %p1778_p4 = pnand %p1777_p3, %p1771_p0 }
 0x3b7   :  { %1581 = vmatprep.subr.bf16.mxu1 %v1715_v29  ;;  %1564 = vmatpush3.bf16.msra.mxu0 %v1716_v30 }
 0x3b8   :  { %1565 = vmatprep.subr.bf16.mxu0 %v1718_v34 }
 0x3ba   :  { %1582 = vmatpush3.bf16.msra.mxu1 %v1717_v31 }
 0x3bb   :  { %1583 = vmatprep.subr.bf16.mxu1 %v1719_v37  ;;  %1566 = vmatpush3.bf16.msra.mxu0 %v1720_v42 }
 0x3bc   :  { %1567 = vmatprep.subr.bf16.mxu0 %v1722_v45 }
 0x3be   :  { %1584 = vmatpush3.bf16.msra.mxu1 %v1721_v44 }
 0x3bf   :  { %1585 = vmatprep.subr.bf16.mxu1 %v1723_v46  ;;  %1568 = vmatpush3.bf16.msra.mxu0 %v1724_v47 }
 0x3c0   :  { %1569 = vmatprep.subr.bf16.mxu0 %v1726_v48 }
 0x3c2   :  { %1586 = vmatpush3.bf16.msra.mxu1 %v1725_v14 }
 0x3c3   :  { %1587 = vmatprep.subr.bf16.mxu1 %v1727_v49  ;;  %1570 = vmatpush3.bf16.msra.mxu0 %v1728_v50 }
 0x3c4   :  { %1571 = vmatprep.subr.bf16.mxu0 %v1730_v52 }
 0x3c6   :  { %1588 = vmatpush3.bf16.msra.mxu1 %v1729_v51 }
 0x3c7   :  { %1589 = vmatprep.subr.bf16.mxu1 %v1731_v53  ;;  %1572 = vmatpush3.bf16.msra.mxu0 %v1732_v38 }
 0x3ca   :  { %1590 = vmatpush3.bf16.msra.mxu1 %v1733_v54 }
 0x3cb   :  { %1591 = vmatprep.subr.bf16.mxu1 %v1734_v40 }
 0x3ce   :  { %1592 = vmatpush3.bf16.msra.mxu1 %v1735_v56 }
 0x3cf   :  { %1593 = vmatprep.subr.bf16.mxu1 %v1736_v59 }
 0x3d2   :  { %1594 = vmatpush3.bf16.msra.mxu1 %v1737_v61 }
 0x46b   :  { %v716_v62 = vpop.f32.mrb[8].mxu1 }
 0x46c   :  { %v1611_v63 = vpop.f32.mrb[9].mxu1 }
 0x46d   :  { %v719_v0 = vpop.f32.mrb[10].mxu1 }
 0x46e   :  { %v723_v1 = vpack.c.bf16 %v719_v0, %v716_v62  ;;  %v1612_v2 = vpop.f32.mrb[11].mxu1 }
 0x470   :  { %724 = vst [vmem:[#allocation2] sm:$0xf] %v723_v1  ;;  %v726_v3 = vrot.slane %v723_v1, 4 }
 0x472   :  { %728 = vst [vmem:[#allocation2 + $0x8] sm:$0xf] %v726_v3 }
 0x478   :  { %v839_v4 = vpop.f32.mrb[12].mxu1 }
 0x479   :  { %v1623_v5 = vpop.f32.mrb[13].mxu1 }
 0x47a   :  { %v842_v33 = vpop.f32.mrb[14].mxu1 }
 0x47b   :  { %v846_v6 = vpack.c.bf16 %v842_v33, %v839_v4  ;;  %v1624_v7 = vpop.f32.mrb[15].mxu1 }
 0x47d   :  { %847 = vst [vmem:[#allocation2 + $0x10] sm:$0xf] %v846_v6  ;;  %v849_v36 = vrot.slane %v846_v6, 4 }
 0x47f   :  { %851 = vst [vmem:[#allocation2 + $0x18] sm:$0xf] %v849_v36 }
 0x480   :  { %v967_v8 = vpop.f32.mrb[16].mxu1 }
 0x481   :  { %v1635_v39 = vpop.f32.mrb[17].mxu1 }
 0x482   :  { %v970_v9 = vpop.f32.mrb[18].mxu1 }
 0x483   :  { %v974_v41 = vpack.c.bf16 %v970_v9, %v967_v8  ;;  %v1636_v10 = vpop.f32.mrb[19].mxu1 }
 0x485   :  { %v976_v11 = vrot.slane %v974_v41, 4  ;;  %979 = vst [vmem:[#allocation2 + $0x8] sm:$0xf0] %v974_v41 }
 0x487   :  { %978 = vst [vmem:[#allocation2] sm:$0xf0] %v976_v11 }
 0x488   :  { %v1095_v12 = vpop.f32.mrb[20].mxu1 }
 0x489   :  { %v1647_v13 = vpop.f32.mrb[21].mxu1 }
 0x48a   :  { %v1098_v15 = vpop.f32.mrb[22].mxu1 }
 0x48b   :  { %v1102_v16 = vpack.c.bf16 %v1098_v15, %v1095_v12  ;;  %v1648_v17 = vpop.f32.mrb[23].mxu1 }
 0x48c   :  { %v1109_v18 = vld [vmem:[#allocation2 + $0x8] sm:$0xff] }
 0x48d   :  { %v1104_v19 = vrot.slane %v1102_v16, 4  ;;  %1107 = vst [vmem:[#allocation2 + $0x18] sm:$0xf0] %v1102_v16  ;;  %1400 = vmatprep.mubr.bf16.mxu0 %v1109_v18 }
 0x48e   :  { %v1108_v20 = vld [vmem:[#allocation2] sm:$0xff] }
 0x48f   :  { %1106 = vst [vmem:[#allocation2 + $0x10] sm:$0xf0] %v1104_v19  ;;  %1401 = vmatmul.mubr.bf16.vlgmr.msra.gmra.mrb[24].mxu0 %v1108_v20 }
 0x494   :  { %v1111_v21 = vld [vmem:[#allocation2 + $0x18] sm:$0xff] }
 0x495   :  { %1441 = vmatprep.mubr.bf16.mxu1 %v1111_v21 }
 0x496   :  { %v1110_v32 = vld [vmem:[#allocation2 + $0x10] sm:$0xff] }
 0x497   :  { %1442 = vmatmul.mubr.bf16.vlgmr.msra.gmra.mrb[24].mxu1 %v1110_v32 }
 0x562   :  { %v1573_v35 = vpop.f32.mrb[24].mxu0 }
 0x563   :  { %v1574_v55 = vpop.f32.mrb[25].mxu0 }
 0x564   :  { %v1575_v57 = vadd.f32 %v1574_v55, %v1573_v35  ;;  %v1576_v58 = vpop.f32.mrb[26].mxu0 }
 0x565   :  { %v1577_v60 = vpop.f32.mrb[27].mxu0 }
 0x566   :  { %v1578_v22 = vadd.f32 %v1577_v60, %v1576_v58 }
 0x56a   :  { %v1595_v23 = vpop.f32.mrb[24].mxu1 }
 0x56b   :  { %v1596_v43 = vpop.f32.mrb[25].mxu1 }
 0x56c   :  { %v1597_v24 = vadd.f32 %v1596_v43, %v1595_v23  ;;  %v1598_v25 = vpop.f32.mrb[26].mxu1 }
 0x56d   :  { %v1599_v26 = vpop.f32.mrb[27].mxu1 }
 0x56e   :  { %v1444_v27 = vadd.f32 %v1597_v24, %v1575_v57  ;;  %v1600_v28 = vadd.f32 %v1599_v26, %v1598_v25 }
 0x570   :  { %1450 = vst.msk [vmem:[#allocation3] sm:$0xff] %vm131_vm0, %v1444_v27  ;;  %v1447_v29 = vadd.f32 %v1600_v28, %v1578_v22 }
 0x572   :  { %1451 = vst.msk [vmem:[#allocation3 + $0x8] sm:$0xff] %vm131_vm0, %v1447_v29 }
 0x573   :  { %1781 = shalt.err (!%p1778_p4)
}
 0x574   :  { %s1782_s8 = scalar_lea.hbm %s2267_s7, 256 }
 0x575   :  { %p1783_p5 = scmp.ne.s32.totalorder %s2267_s7, %s1782_s8  ;;  %p1786_p6 = scmp.lt.u32.totalorder %s1782_s8, %s2267_s7 }
 0x577   :  { %p1788_p7 = pnand %p1786_p6, %p1783_p5 }
 0x579   :  { %1791 = shalt.err (!%p1788_p7)
}
 0x57a   :  { %s1800_s11 = smov 128   ;;  %s1801_s12 = smov 8  }
 0x57b   :  { %1463 = dma.vmem_to_hbm [thread:$0]  %s1458_s27, 256, %s2267_s7, [#allocation4], %s1800_s11, %s1800_s11, %s1801_s12  }
 0x57c   :  { %1792 = dma.done.wait [#allocation4], 256  }
 0x57d   :  { %1793 = vsyncadd [#allocation4], 4294967040 }
 0x57e   :  { %1467 = vsyncpa [#allocation4], 1 }

</bundles_post_ra>
